<compile_context>
chip_gen: v7x
topology: tpu7x:2x2x1
jax: 0.10.0
libtpu: 0.0.40
codegen_flags: <defaults>
</compile_context>

<pallas_src>
import math
import jax
import jax.numpy as jnp
from jax.experimental import pallas as pl
from jax.experimental.pallas import tpu as pltpu


def _round_up(x, m):
    return ((x + m - 1) // m) * m


def _flinear_kernel(x_ref, vt_ref, s_ref, ut_ref, b_ref, o_ref):
    # Stage 1: (tm, in_p) @ (in_p, k_p) -> (tm, k_p), f32 accumulation on MXU.
    t = jnp.dot(x_ref[...], vt_ref[...], preferred_element_type=jnp.float32)
    # Scale columns by singular values (VPU, broadcast of a (1, k_p) row).
    t = t * s_ref[...]
    # Stage 2: (tm, k_p) @ (k_p, tn) -> (tm, tn), f32 accumulation on MXU.
    y = jnp.dot(t.astype(x_ref.dtype), ut_ref[...],
                preferred_element_type=jnp.float32)
    o_ref[...] = (y + b_ref[...]).astype(o_ref.dtype)


def flinear_forward(x, U, S, V, bias=None, *, tm_max=512, tn_max=512):
    """x: (..., in_features). U:(out,k) S:(k,) V:(k,in) bias:(out,)|None.
    Returns (..., out_features)."""
    k, in_features = V.shape
    out_features = U.shape[0]
    if bias is None:
        bias = jnp.zeros((out_features,), dtype=x.dtype)

    lead = x.shape[:-1]
    M = int(math.prod(lead)) if lead else 1

    # --- lane/sublane friendly padded sizes -------------------------------
    in_p = _round_up(in_features, 128)
    k_p = _round_up(k, 128)
    n_p = _round_up(out_features, 128)

    # Tile sizes.  tm: largest of {tm_max, round_up(M,8)}; tn: largest of
    # {512,256,128} that divides n_p (n_p is a multiple of 128 so 128 works).
    tm = min(tm_max, _round_up(M, 8))
    m_p = _round_up(M, tm)
    tn = next(t for t in (tn_max, 256, 128) if n_p % t == 0)

    # --- pad operands (zeros are inert for the factored matmul) -----------
    x2d = x.reshape(M, in_features)
    x_pad = jnp.zeros((m_p, in_p), dtype=x.dtype).at[:M, :in_features].set(x2d)
    # V^T : (in, k) -> (in_p, k_p)
    vt_pad = jnp.zeros((in_p, k_p), dtype=V.dtype).at[:in_features, :k].set(V.T)
    # U^T : (k, out) -> (k_p, n_p)
    ut_pad = jnp.zeros((k_p, n_p), dtype=U.dtype).at[:k, :out_features].set(U.T)
    s_pad = jnp.zeros((1, k_p), dtype=S.dtype).at[0, :k].set(S)
    b_pad = jnp.zeros((1, n_p), dtype=bias.dtype).at[0, :out_features].set(bias)

    grid = (m_p // tm, n_p // tn)

    cost = pl.CostEstimate(
        flops=2 * m_p * in_p * k_p + 2 * m_p * k_p * n_p,
        transcendentals=0,
        bytes_accessed=(x_pad.size * x_pad.dtype.itemsize
                        + vt_pad.size * vt_pad.dtype.itemsize
                        + ut_pad.size * ut_pad.dtype.itemsize
                        + s_pad.size * s_pad.dtype.itemsize
                        + b_pad.size * b_pad.dtype.itemsize
                        + m_p * n_p * x.dtype.itemsize),
    )

    out = pl.pallas_call(
        _flinear_kernel,
        out_shape=jax.ShapeDtypeStruct((m_p, n_p), x.dtype),
        grid=grid,
        in_specs=[
            pl.BlockSpec((tm, in_p), lambda i, j: (i, 0)),   # x tile
            pl.BlockSpec((in_p, k_p), lambda i, j: (0, 0)),  # V^T (resident)
            pl.BlockSpec((1, k_p), lambda i, j: (0, 0)),     # S row
            pl.BlockSpec((k_p, tn), lambda i, j: (0, j)),    # U^T column tile
            pl.BlockSpec((1, tn), lambda i, j: (0, j)),      # bias tile
        ],
        out_specs=pl.BlockSpec((tm, tn), lambda i, j: (i, j)),
        compiler_params=pltpu.CompilerParams(
            dimension_semantics=("parallel", "parallel"),
            vmem_limit_bytes=64 * 1024 * 1024,
        ),
        cost_estimate=cost,
    )(x_pad, vt_pad, s_pad, ut_pad, b_pad)

    return out[:M, :out_features].reshape(*lead, out_features)


if __name__ == "__main__":
    # Small, deterministic synthetic setup (shapes implied by FLinear.__init__).
    batch, seq = 2, 8
    in_features, out_features = 32, 48
    # rank_k=0  ->  k = int(out*in / (out+in))
    k = int(out_features * in_features / (out_features + in_features))  # 19

    key = jax.random.PRNGKey(0)
    kx, ku, ks, kv, kb = jax.random.split(key, 5)

    # Deterministic synthetic parameters (torch init uses kaiming + SVD; here we
    # only need deterministic values of the right shapes).
    x = jax.random.normal(kx, (batch, seq, in_features), dtype=jnp.float32)
    U = jax.random.normal(ku, (out_features, k), dtype=jnp.float32) / math.sqrt(k)
    S = jax.random.uniform(ks, (k,), dtype=jnp.float32,
                           minval=-1.0 / math.sqrt(k), maxval=1.0 / math.sqrt(k))
    V = jax.random.normal(kv, (k, in_features), dtype=jnp.float32) / math.sqrt(in_features)
    bound = 1.0 / math.sqrt(in_features)
    bias = jax.random.uniform(kb, (out_features,), dtype=jnp.float32,
                              minval=-bound, maxval=bound)

    y = flinear_forward(x, U, S, V, bias)
    y = jax.block_until_ready(y)

    # Reference (plain JAX): W = U @ (S[:,None]*V); y = x @ W^T + b
    W = U @ (S[:, None] * V)
    y_ref = jnp.einsum("bsi,oi->bso", x, W) + bias
    assert y.shape == (batch, seq, out_features)
    assert jnp.allclose(y, y_ref, atol=1e-5, rtol=1e-5)

    print("KERNEL_OK")
</pallas_src>

<mosaic_0001>
module attributes {stable_mosaic.version = 11 : i64} {
  func.func @_flinear_kernel(%arg0: i32, %arg1: i32, %arg2: memref<16x128xf32, #tpu.memory_space<vmem>>, %arg3: memref<128x128xf32, #tpu.memory_space<vmem>>, %arg4: memref<1x128xf32, #tpu.memory_space<vmem>>, %arg5: memref<128x128xf32, #tpu.memory_space<vmem>>, %arg6: memref<1x128xf32, #tpu.memory_space<vmem>>, %arg7: memref<16x128xf32, #tpu.memory_space<vmem>>) attributes {dimension_semantics = [#tpu.dimension_semantics<parallel>, #tpu.dimension_semantics<parallel>], iteration_bounds = array<i64: 1, 1>, scalar_prefetch = 0 : i64, scratch_operands = 0 : i64, tpu.core_type = #tpu.core_type<tc>, window_params = [{transform_indices = @transform_0, window_bounds = array<i64: 16, 128>}, {pipeline_mode = #tpu.pipeline_mode<synchronous>, transform_indices = @transform_1, window_bounds = array<i64: 128, 128>}, {pipeline_mode = #tpu.pipeline_mode<synchronous>, transform_indices = @transform_2, window_bounds = array<i64: 1, 128>}, {transform_indices = @transform_3, window_bounds = array<i64: 128, 128>}, {transform_indices = @transform_4, window_bounds = array<i64: 1, 128>}, {transform_indices = @transform_5, window_bounds = array<i64: 16, 128>}]} {
    %c0 = arith.constant 0 : index
    %c0_0 = arith.constant 0 : index
    %0 = vector.load %arg2[%c0, %c0_0] : memref<16x128xf32, #tpu.memory_space<vmem>>, vector<16x128xf32>
    %c0_1 = arith.constant 0 : index
    %c0_2 = arith.constant 0 : index
    %1 = vector.load %arg3[%c0_1, %c0_2] : memref<128x128xf32, #tpu.memory_space<vmem>>, vector<128x128xf32>
    %cst = arith.constant dense<0.000000e+00> : vector<16x128xf32>
    %2 = tpu.matmul %0, %1, %cst {dimension_numbers = #tpu.dot_dimension_numbers<[1], [0], [0], [1], [0, 0, 1, 1], [], []>} : vector<16x128xf32>, vector<128x128xf32>, vector<16x128xf32> -> vector<16x128xf32>
    %c0_3 = arith.constant 0 : index
    %c0_4 = arith.constant 0 : index
    %3 = vector.load %arg4[%c0_3, %c0_4] : memref<1x128xf32, #tpu.memory_space<vmem>>, vector<1x128xf32>
    %4 = vector.broadcast %3 : vector<1x128xf32> to vector<16x128xf32>
    %5 = arith.mulf %2, %4 : vector<16x128xf32>
    %c0_5 = arith.constant 0 : index
    %c0_6 = arith.constant 0 : index
    %6 = vector.load %arg5[%c0_5, %c0_6] : memref<128x128xf32, #tpu.memory_space<vmem>>, vector<128x128xf32>
    %cst_7 = arith.constant dense<0.000000e+00> : vector<16x128xf32>
    %7 = tpu.matmul %5, %6, %cst_7 {dimension_numbers = #tpu.dot_dimension_numbers<[1], [0], [0], [1], [0, 0, 1, 1], [], []>} : vector<16x128xf32>, vector<128x128xf32>, vector<16x128xf32> -> vector<16x128xf32>
    %c0_8 = arith.constant 0 : index
    %c0_9 = arith.constant 0 : index
    %8 = vector.load %arg6[%c0_8, %c0_9] : memref<1x128xf32, #tpu.memory_space<vmem>>, vector<1x128xf32>
    %9 = vector.broadcast %8 : vector<1x128xf32> to vector<16x128xf32>
    %10 = arith.addf %7, %9 : vector<16x128xf32>
    %c0_10 = arith.constant 0 : index
    %c0_11 = arith.constant 0 : index
    %11 = vector.load %arg7[%c0_10, %c0_11] : memref<16x128xf32, #tpu.memory_space<vmem>>, vector<16x128xf32>
    tpu.vector_store %arg7[%c0_10, %c0_11], %10 {strides = array<i32>} : memref<16x128xf32, #tpu.memory_space<vmem>>, vector<16x128xf32>,
    return
  }
  func.func @transform_0(%arg0: i32, %arg1: i32) -> (i32, i32) {
    %c0_i32 = arith.constant 0 : i32
    %c0_i32_0 = arith.constant 0 : i32
    return %arg0, %c0_i32 : i32, i32
  }
  func.func @transform_1(%arg0: i32, %arg1: i32) -> (i32, i32) {
    %c0_i32 = arith.constant 0 : i32
    %c0_i32_0 = arith.constant 0 : i32
    %c0_i32_1 = arith.constant 0 : i32
    return %c0_i32, %c0_i32_0 : i32, i32
  }
  func.func @transform_2(%arg0: i32, %arg1: i32) -> (i32, i32) {
    %c0_i32 = arith.constant 0 : i32
    %c0_i32_0 = arith.constant 0 : i32
    %c0_i32_1 = arith.constant 0 : i32
    return %c0_i32, %c0_i32_0 : i32, i32
  }
  func.func @transform_3(%arg0: i32, %arg1: i32) -> (i32, i32) {
    %c0_i32 = arith.constant 0 : i32
    %c0_i32_0 = arith.constant 0 : i32
    return %c0_i32, %arg1 : i32, i32
  }
  func.func @transform_4(%arg0: i32, %arg1: i32) -> (i32, i32) {
    %c0_i32 = arith.constant 0 : i32
    %c0_i32_0 = arith.constant 0 : i32
    return %c0_i32, %arg1 : i32, i32
  }
  func.func @transform_5(%arg0: i32, %arg1: i32) -> (i32, i32) {
    %c0_i32 = arith.constant 0 : i32
    return %arg0, %arg1 : i32, i32
  }
}

</mosaic_0001>

<bundles_post_ra>
// kernel: tpu_custom_call.1
= control target key start
LH: loop header
LB: loop body
LE: loop exit
PB: predicated region body
PF: predicated region fallthrough
CT: control target
= control target key end

     0   :  { %10 = vsyncpa [#allocation3], 0  ;;  %s755_s0 = inlined_call_operand.hbm [shape: f32[16,128], index: 0, kind: input, shape index: {}]   ;;  %s756_s1 = inlined_call_operand.hbm [shape: f32[128,128], index: 1, kind: input, shape index: {}]   ;;  %s757_s2 = inlined_call_operand.hbm [shape: f32[1,128], index: 2, kind: input, shape index: {}]   ;;  %s758_s3 = inlined_call_operand.hbm [shape: f32[128,128], index: 3, kind: input, shape index: {}]   ;;  %s759_s4 = inlined_call_operand.hbm [shape: f32[1,128], index: 4, kind: input, shape index: {}]   ;;  %s760_s5 = inlined_call_operand.hbm [shape: f32[16,128], index: 5, kind: output, shape index: {}]  }
   0x1   :  { %11 = vsyncpa [#allocation6], 0 }
   0x2   :  { %12 = vsyncpa [#allocation9], 0 }
   0x3   :  { %13 = vsyncpa [#allocation4], 0  ;;  %s626_s18 = smov [#allocation5]   ;;  %s627_s20 = smov [#allocation8]  }
   0x4   :  { %s31_s19 = sshll.u32 %s626_s18, 4  ;;  %s53_s21 = sshll.u32 %s627_s20, 4  ;;  %s32_s19 = int_to_ptr.vmem [resolvable:$true] %s31_s19  ;;  %s664_s21 = int_to_ptr.vmem [resolvable:$true] %s53_s21 }
   0x5   :  { %s486_s24 = scalar_lea.hbm %s756_s1, 2048 }
   0x6   :  { %p487_p0 = scmp.ne.s32.totalorder %s756_s1, %s486_s24  ;;  %p490_p1 = scmp.lt.u32.totalorder %s486_s24, %s756_s1 }
   0x8   :  { %p492_p2 = pnand %p490_p1, %p487_p0 }
   0xa   :  { %495 = shalt.err (!%p492_p2)
}
   0xb   :  { %s496_s29 = scalar_lea.vmem %s32_s19, 2048  ;;  %p501_p4 = scmp.lt.s32.totalorder %s32_s19, %s32_s19 }
   0xc   :  { %p497_p3 = scmp.ne.s32.totalorder %s32_s19, %s496_s29  ;;  %p502_p5 = scmp.lt.s32.totalorder %s496_s29, %s496_s29 }
   0xe   :  { %p503_p6 = por %p502_p5, %p501_p4 }
  0x10   :  { %p504_p7 = pnand %p503_p6, %p497_p3 }
  0x12   :  { %507 = shalt.err (!%p504_p7)
}
  0x13   :  { %s628_s30 = smov 128   ;;  %s629_s6 = smov 8  }
  0x14   :  { %37 = dma.hbm_to_vmem [thread:$0]  %s756_s1, 2048, %s32_s19, [#allocation6], %s628_s30, %s628_s30, %s629_s6  }
  0x15   :  { %s508_s11 = scalar_lea.hbm %s758_s3, 2048 }
  0x16   :  { %p509_p8 = scmp.ne.s32.totalorder %s758_s3, %s508_s11  ;;  %p512_p9 = scmp.lt.u32.totalorder %s508_s11, %s758_s3 }
  0x18   :  { %p514_p10 = pnand %p512_p9, %p509_p8 }
  0x1a   :  { %517 = shalt.err (!%p514_p10)
}
  0x1b   :  { %s518_s16 = scalar_lea.vmem %s664_s21, 2048  ;;  %p523_p12 = scmp.lt.s32.totalorder %s664_s21, %s664_s21 }
  0x1c   :  { %p519_p11 = scmp.ne.s32.totalorder %s664_s21, %s518_s16  ;;  %p524_p13 = scmp.lt.s32.totalorder %s518_s16, %s518_s16 }
  0x1e   :  { %p525_p0 = por %p524_p13, %p523_p12 }
  0x20   :  { %p526_p1 = pnand %p525_p0, %p519_p11 }
  0x22   :  { %529 = shalt.err (!%p526_p1)
}
  0x23   :  { %59 = dma.hbm_to_vmem [thread:$0]  %s758_s3, 2048, %s664_s21, [#allocation9], %s628_s30, %s628_s30, %s629_s6  }
  0x24   :  { %s630_s18 = smov [#allocation2]   ;;  %s631_s20 = smov [#allocation7]  }
  0x25   :  { %s19_s19 = sshll.u32 %s630_s18, 4  ;;  %s44_s22 = sshll.u32 %s631_s20, 4  ;;  %s20_s19 = int_to_ptr.vmem [resolvable:$true] %s19_s19  ;;  %s45_s22 = int_to_ptr.vmem [resolvable:$true] %s44_s22 }
  0x26   :  { %s530_s25 = scalar_lea.hbm %s755_s0, 256 }
  0x27   :  { %p531_p2 = scmp.ne.s32.totalorder %s755_s0, %s530_s25  ;;  %p534_p3 = scmp.lt.u32.totalorder %s530_s25, %s755_s0 }
  0x29   :  { %p536_p4 = pnand %p534_p3, %p531_p2 }
  0x2b   :  { %539 = shalt.err (!%p536_p4)
}
  0x2c   :  { %s540_s3 = scalar_lea.vmem %s20_s19, 256  ;;  %p545_p6 = scmp.lt.s32.totalorder %s20_s19, %s20_s19 }
  0x2d   :  { %p541_p5 = scmp.ne.s32.totalorder %s20_s19, %s540_s3  ;;  %p546_p7 = scmp.lt.s32.totalorder %s540_s3, %s540_s3 }
  0x2f   :  { %p547_p8 = por %p546_p7, %p545_p6 }
  0x31   :  { %p548_p9 = pnand %p547_p8, %p541_p5 }
  0x33   :  { %551 = shalt.err (!%p548_p9)
}
  0x34   :  { %25 = dma.hbm_to_vmem [thread:$0]  %s755_s0, 256, %s20_s19, [#allocation3], %s628_s30, %s628_s30, %s629_s6  }
  0x35   :  { %s552_s10 = scalar_lea.hbm %s757_s2, 16 }
  0x36   :  { %p553_p10 = scmp.ne.s32.totalorder %s757_s2, %s552_s10  ;;  %p556_p11 = scmp.lt.u32.totalorder %s552_s10, %s757_s2 }
  0x38   :  { %p558_p12 = pnand %p556_p11, %p553_p10 }
  0x3a   :  { %561 = shalt.err (!%p558_p12)
}
  0x3b   :  { %s562_s15 = scalar_lea.vmem %s45_s22, 16  ;;  %s566_s16 = scalar_lea.vmem %s45_s22, 32 }
  0x3c   :  { %p563_p13 = scmp.ne.s32.totalorder %s45_s22, %s562_s15  ;;  %p567_p0 = scmp.lt.s32.totalorder %s45_s22, %s45_s22 }
  0x3d   :  { %p568_p1 = scmp.lt.s32.totalorder %s566_s16, %s562_s15 }
  0x3f   :  { %p569_p2 = por %p568_p1, %p567_p0 }
  0x41   :  { %p570_p3 = pnand %p569_p2, %p563_p13 }
  0x43   :  { %573 = shalt.err (!%p570_p3)
}
  0x44   :  { %47 = dma.hbm_to_vmem [thread:$0]  %s757_s2, 16, %s45_s22, [#allocation6]  }
  0x45   :  { %s632_s17 = smov [#allocation10]   ;;  %s574_s23 = scalar_lea.hbm %s759_s4, 16 }
  0x46   :  { %s66_s18 = sshll.u32 %s632_s17, 4  ;;  %p575_p4 = scmp.ne.s32.totalorder %s759_s4, %s574_s23  ;;  %s67_s18 = int_to_ptr.vmem [resolvable:$true] %s66_s18 }
  0x47   :  { %p578_p5 = scmp.lt.u32.totalorder %s574_s23, %s759_s4 }
  0x49   :  { %p580_p6 = pnand %p578_p5, %p575_p4 }
  0x4b   :  { %583 = shalt.err (!%p580_p6)
}
  0x4c   :  { %s584_s28 = scalar_lea.vmem %s67_s18, 16  ;;  %s588_s2 = scalar_lea.vmem %s67_s18, 32 }
  0x4d   :  { %p585_p7 = scmp.ne.s32.totalorder %s67_s18, %s584_s28  ;;  %p589_p8 = scmp.lt.s32.totalorder %s67_s18, %s67_s18 }
  0x4e   :  { %p590_p9 = scmp.lt.s32.totalorder %s588_s2, %s584_s28 }
  0x50   :  { %p591_p10 = por %p590_p9, %p589_p8 }
  0x52   :  { %p592_p11 = pnand %p591_p10, %p585_p7 }
  0x54   :  { %595 = shalt.err (!%p592_p11)
}
  0x55   :  { %69 = dma.hbm_to_vmem [thread:$0]  %s759_s4, 16, %s67_s18, [#allocation9]  }
  0x56   :  { %618 = dma.done.wait [#allocation3], 256  }
  0x57   :  { %619 = vsyncadd [#allocation3], 4294967040 }
  0x58   :  { %620 = dma.done.wait [#allocation6], 2064  }
  0x59   :  { %621 = vsyncadd [#allocation6], 4294965232 }
  0x5a   :  { %622 = dma.done.wait [#allocation9], 2064  }
  0x5b   :  { %623 = vsyncadd [#allocation9], 4294965232  ;;  %v87_v0 = vld [vmem:[#allocation5] sm:$0xff]  ;;  %v88_v1 = vld [vmem:[#allocation5 + $0x8] sm:$0xff]  ;;  %s633_s4 = smov [#allocation11]  }
  0x5c   :  { %v89_v2 = vld [vmem:[#allocation5 + $0x10] sm:$0xff]  ;;  %v414_v3 = vpack.c.bf16 %v88_v1, %v87_v0  ;;  %v90_v4 = vld [vmem:[#allocation5 + $0x18] sm:$0xff]  ;;  %v91_v6 = vld [vmem:[#allocation5 + $0x20] sm:$0xff]  ;;  %s292_s3 = sshll.u32 %s633_s4, 4  ;;  %s293_s3 = int_to_ptr.vmem [resolvable:$true] %s292_s3 }
  0x5d   :  { %v418_v5 = vpack.c.bf16 %v90_v4, %v89_v2  ;;  %v92_v7 = vld [vmem:[#allocation5 + $0x28] sm:$0xff]  ;;  %v93_v9 = vld [vmem:[#allocation5 + $0x30] sm:$0xff]  ;;  %v94_v10 = vld [vmem:[#allocation5 + $0x38] sm:$0xff]  ;;  %s596_s21 = scalar_lea.vmem %s293_s3, 256  ;;  %p601_p13 = scmp.lt.s32.totalorder %s293_s3, %s293_s3 }
  0x5e   :  { %415 = vmatprep.subr.bf16.mxu0 %v414_v3  ;;  %v422_v8 = vpack.c.bf16 %v92_v7, %v91_v6  ;;  %v85_v11 = vld [vmem:[#allocation2] sm:$0xff]  ;;  %v187_v12 = vld [vmem:[#allocation8] sm:$0xff]  ;;  %v190_v16 = vld [vmem:[#allocation8 + $0x18] sm:$0xff]  ;;  %v426_v20 = vpack.c.bf16 %v94_v10, %v93_v9  ;;  %p597_p12 = scmp.ne.s32.totalorder %s293_s3, %s596_s21  ;;  %p602_p0 = scmp.lt.s32.totalorder %s596_s21, %s596_s21 }
  0x5f   :  { %417 = vmatpush3.bf16.msra.mxu0 %v414_v3  ;;  %376 = vmatprep.mubr.f32.mxu0 %v85_v11  ;;  %v188_v13 = vld [vmem:[#allocation8 + $0x8] sm:$0xff]  ;;  %v189_v14 = vld [vmem:[#allocation8 + $0x10] sm:$0xff]  ;;  %v191_v18 = vld [vmem:[#allocation8 + $0x20] sm:$0xff] }
  0x60   :  { %419 = vmatprep.subr.bf16.mxu0 %v418_v5  ;;  %v446_v15 = vpack.c.bf16 %v188_v13, %v187_v12  ;;  %v450_v17 = vpack.c.bf16 %v190_v16, %v189_v14  ;;  %v192_v19 = vld [vmem:[#allocation8 + $0x28] sm:$0xff]  ;;  %v95_v21 = vld [vmem:[#allocation5 + $0x40] sm:$0xff]  ;;  %v193_v24 = vld [vmem:[#allocation8 + $0x30] sm:$0xff]  ;;  %p603_p1 = por %p602_p0, %p601_p13 }
  0x61   :  { %v96_v22 = vld [vmem:[#allocation5 + $0x48] sm:$0xff]  ;;  %v454_v23 = vpack.c.bf16 %v192_v19, %v191_v18  ;;  %v194_v25 = vld [vmem:[#allocation8 + $0x38] sm:$0xff]  ;;  %v97_v27 = vld [vmem:[#allocation5 + $0x50] sm:$0xff] }
  0x62   :  { %447 = vmatprep.subr.bf16.mxu1 %v446_v15  ;;  %v430_v26 = vpack.c.bf16 %v96_v22, %v95_v21  ;;  %v98_v28 = vld [vmem:[#allocation5 + $0x58] sm:$0xff]  ;;  %v458_v29 = vpack.c.bf16 %v194_v25, %v193_v24  ;;  %v195_v30 = vld [vmem:[#allocation8 + $0x40] sm:$0xff]  ;;  %v196_v31 = vld [vmem:[#allocation8 + $0x48] sm:$0xff]  ;;  %p604_p2 = pnand %p603_p1, %p597_p12 }
  0x63   :  { %421 = vmatpush3.bf16.msra.mxu0 %v418_v5  ;;  %449 = vmatpush3.bf16.msra.mxu1 %v446_v15  ;;  %v434_v32 = vpack.c.bf16 %v98_v28, %v97_v27  ;;  %v99_v33 = vld [vmem:[#allocation5 + $0x60] sm:$0xff]  ;;  %v100_v34 = vld [vmem:[#allocation5 + $0x68] sm:$0xff]  ;;  %v462_v35 = vpack.c.bf16 %v196_v31, %v195_v30  ;;  %v197_v36 = vld [vmem:[#allocation8 + $0x50] sm:$0xff] }
  0x64   :  { %423 = vmatprep.subr.bf16.mxu0 %v422_v8  ;;  %451 = vmatprep.subr.bf16.mxu1 %v450_v17  ;;  %v198_v37 = vld [vmem:[#allocation8 + $0x58] sm:$0xff]  ;;  %v438_v38 = vpack.c.bf16 %v100_v34, %v99_v33  ;;  %v101_v39 = vld [vmem:[#allocation5 + $0x70] sm:$0xff]  ;;  %v199_v42 = vld [vmem:[#allocation8 + $0x60] sm:$0xff] }
  0x65   :  { %v102_v40 = vld [vmem:[#allocation5 + $0x78] sm:$0xff]  ;;  %v466_v41 = vpack.c.bf16 %v198_v37, %v197_v36  ;;  %v200_v43 = vld [vmem:[#allocation8 + $0x68] sm:$0xff]  ;;  %v306_v50 = vld [vmem:[#allocation7] ss:$0 sm:$0xff] }
  0x66   :  { %v442_v44 = vpack.c.bf16 %v102_v40, %v101_v39  ;;  %v470_v45 = vpack.c.bf16 %v200_v43, %v199_v42  ;;  %v86_v46 = vld [vmem:[#allocation2 + $0x8] sm:$0xff]  ;;  %v307_v55 = vld [vmem:[#allocation10] ss:$0 sm:$0xff] }
  0x67   :  { %425 = vmatpush3.bf16.msra.mxu0 %v422_v8  ;;  %453 = vmatpush3.bf16.msra.mxu1 %v450_v17  ;;  %v201_v47 = vld [vmem:[#allocation8 + $0x70] sm:$0xff]  ;;  %v202_v48 = vld [vmem:[#allocation8 + $0x78] sm:$0xff] }
  0x68   :  { %427 = vmatprep.subr.bf16.mxu0 %v426_v20  ;;  %455 = vmatprep.subr.bf16.mxu1 %v454_v23  ;;  %v474_v49 = vpack.c.bf16 %v202_v48, %v201_v47 }
  0x6b   :  { %429 = vmatpush3.bf16.msra.mxu0 %v426_v20  ;;  %457 = vmatpush3.bf16.msra.mxu1 %v454_v23 }
  0x6c   :  { %431 = vmatprep.subr.bf16.mxu0 %v430_v26  ;;  %459 = vmatprep.subr.bf16.mxu1 %v458_v29 }
  0x6f   :  { %433 = vmatpush3.bf16.msra.mxu0 %v430_v26  ;;  %461 = vmatpush3.bf16.msra.mxu1 %v458_v29 }
  0x70   :  { %435 = vmatprep.subr.bf16.mxu0 %v434_v32  ;;  %463 = vmatprep.subr.bf16.mxu1 %v462_v35 }
  0x73   :  { %437 = vmatpush3.bf16.msra.mxu0 %v434_v32  ;;  %465 = vmatpush3.bf16.msra.mxu1 %v462_v35 }
  0x74   :  { %439 = vmatprep.subr.bf16.mxu0 %v438_v38  ;;  %467 = vmatprep.subr.bf16.mxu1 %v466_v41 }
  0x77   :  { %441 = vmatpush3.bf16.msra.mxu0 %v438_v38  ;;  %469 = vmatpush3.bf16.msra.mxu1 %v466_v41 }
  0x78   :  { %443 = vmatprep.subr.bf16.mxu0 %v442_v44  ;;  %471 = vmatprep.subr.bf16.mxu1 %v470_v45 }
  0x7b   :  { %445 = vmatpush3.bf16.msra.mxu0 %v442_v44  ;;  %473 = vmatpush3.bf16.msra.mxu1 %v470_v45 }
  0x7c   :  { %475 = vmatprep.subr.bf16.mxu1 %v474_v49 }
  0x7e   :  { %377 = vmatmul.mubr.f32.vlgmr.msra.gmra.mrb[0].mxu0 %v86_v46 }
  0x7f   :  { %477 = vmatpush3.bf16.msra.mxu1 %v474_v49 }
 0x151   :  { %v378_v51 = vpop.f32.mrb[0].mxu0 }
 0x152   :  { %v169_v52 = vpop.f32.mrb[1].mxu0  ;;  %v186_v54 = vmul.f32 %v378_v51, %v306_v50 }
 0x153   :  { %v185_v53 = vmul.f32 %v306_v50, %v169_v52 }
 0x155   :  { %411 = vmatprep.mubr.f32.mxu1 %v185_v53 }
 0x156   :  { %412 = vmatmul.mubr.f32.vlgmr.msra.gmra.mrb[0].mxu1 %v186_v54 }
 0x229   :  { %v413_v56 = vpop.f32.mrb[0].mxu1 }
 0x22a   :  { %v282_v57 = vadd.f32 %v413_v56, %v307_v55  ;;  %v276_v58 = vpop.f32.mrb[1].mxu1 }
 0x22b   :  { %v277_v59 = vadd.f32 %v307_v55, %v276_v58 }
 0x22c   :  { %286 = vst [vmem:[#allocation11 + $0x8] sm:$0xff] %v282_v57 }
 0x22d   :  { %285 = vst [vmem:[#allocation11] sm:$0xff] %v277_v59 }
 0x22e   :  { %607 = shalt.err (!%p604_p2)
}
 0x22f   :  { %s608_s9 = scalar_lea.hbm %s760_s5, 256 }
 0x230   :  { %p609_p3 = scmp.ne.s32.totalorder %s760_s5, %s608_s9  ;;  %p612_p4 = scmp.lt.u32.totalorder %s608_s9, %s760_s5 }
 0x232   :  { %p614_p5 = pnand %p612_p4, %p609_p3 }
 0x234   :  { %617 = shalt.err (!%p614_p5)
}
 0x235   :  { %298 = dma.vmem_to_hbm [thread:$0]  %s293_s3, 256, %s760_s5, [#allocation4], %s628_s30, %s628_s30, %s629_s6  }
 0x236   :  { %624 = dma.done.wait [#allocation4], 256  }
 0x237   :  { %625 = vsyncadd [#allocation4], 4294967040 }
 0x238   :  { %302 = vsyncpa [#allocation3], 1 }
 0x239   :  { %303 = vsyncpa [#allocation6], 1 }
 0x23a   :  { %304 = vsyncpa [#allocation9], 1 }
 0x23b   :  { %305 = vsyncpa [#allocation4], 1 }

</bundles_post_ra>
